<compile_context>
chip_gen: v6e
topology: v6e:2x2x1
jax: 0.10.0
libtpu: 0.0.40
codegen_flags: <defaults>
</compile_context>

<pallas_src>
import functools

import jax
import jax.numpy as jnp
from jax.experimental import pallas as pl
from jax.experimental.pallas import tpu as pltpu


def _round_up(x, m):
    return (x + m - 1) // m * m


def _tiled_bytes(rows, cols, dtype):
    """Real VMEM footprint of a (rows, cols) buffer after (sublane,128) tiling."""
    itemsize = jnp.dtype(dtype).itemsize
    sublane = 8 * max(1, 4 // itemsize)      # 8 for f32, 16 for bf16, 32 for int8
    return _round_up(rows, sublane) * _round_up(cols, 128) * itemsize


def _vmem_physical_bytes():
    try:
        info = pltpu.get_tpu_info()
        cap = getattr(info, "vmem_capacity_bytes", None)
        if cap:
            return int(cap)
    except Exception:
        pass
    return 64 * 1024 * 1024                  # v7x floor (smallest of v5e/v6e/v7x)


def _conv_relu_kernel(x_ref, h_ref, w_ref, b_ref, o_ref, *, TH, KH,
                      negative_slope, compute_dtype):
    # x_ref: (1, TH, WpC)        body rows of padded input, lane dim = W*Cin
    # h_ref: (1, 1, KH-1, WpC)   the KH-1 rows directly below this tile
    # w_ref: (KH, WpC, WoC)      block-Toeplitz weights (zeros off the band)
    # b_ref: (1, WoC)            bias pre-tiled to the output-slab layout, f32
    # o_ref: (1, TH, WoC)        lane-dense output slab (WoC multiple of 128)
    body = x_ref[0]                                   # (TH, WpC)   f32
    halo = h_ref[0, 0]                                # (KH-1, WpC) f32

    # kh = 0 needs no row shift: the body block is already the right window.
    acc = jnp.dot(body.astype(compute_dtype), w_ref[0],
                  preferred_element_type=jnp.float32)   # (TH, WoC) f32

    # kh >= 1: the shifted row window spans body[kh:] plus the first kh halo rows.
    slab = jnp.concatenate([body, halo], axis=0)      # (TH + KH - 1, WpC)
    for kh in range(1, KH):
        acc = acc + jnp.dot(slab[kh:kh + TH].astype(compute_dtype), w_ref[kh],
                            preferred_element_type=jnp.float32)

    acc = acc + b_ref[...]                            # f32 epilogue
    out = jnp.where(acc >= 0, acc, negative_slope * acc)   # LeakyReLU(0.1)
    o_ref[0] = out.astype(o_ref.dtype)


def conv_relu(x_nchw, weight_oihw, bias, *, stride=1, pad=1,
              negative_slope=0.1, compute_dtype=jnp.float32, row_tile=None):
    """Conv2d(k, stride=1, padding=pad, bias=True) + LeakyReLU(0.1).

    x_nchw:      (N, Cin, H, W)      float32
    weight_oihw: (Cout, Cin, KH, KW) float32
    bias:        (Cout,)             float32
    returns      (N, Cout, H, W)     float32
    """
    assert stride == 1, "TODO(synk): only stride=1 (module default) implemented"
    N, Cin, H, W = x_nchw.shape
    Cout, Cin_w, KH, KW = weight_oihw.shape
    assert Cin == Cin_w

    Ho = H + 2 * pad - KH + 1
    Wo = W + 2 * pad - KW + 1
    Wp = W + 2 * pad
    assert Ho % 8 == 0, "TODO(synk): ragged output heights need masked edge tiles"

    in_dtype = x_nchw.dtype
    WpC = Wp * Cin
    WoC = Wo * Cout
    WpC_pad = _round_up(WpC, 128)    # lane-dense, 128-aligned input slab width
    WoC_pad = _round_up(WoC, 128)    # lane-dense, 128-aligned output slab width

    # ---- VMEM budget with (sublane,128)-tiled sizes; limit from hardware info.
    vmem_limit = min(_vmem_physical_bytes() // 2, 64 * 1024 * 1024)

    def vmem_need(TH):
        body = 2 * _tiled_bytes(TH, WpC_pad, in_dtype)          # double-buffered
        halo = 2 * _tiled_bytes(KH - 1, WpC_pad, in_dtype)
        wts = 2 * KH * _tiled_bytes(WpC_pad, WoC_pad, compute_dtype)
        bias_b = 2 * _tiled_bytes(1, WoC_pad, jnp.float32)
        outb = 2 * _tiled_bytes(TH, WoC_pad, in_dtype)
        # in-kernel temporaries: slab concat, cast/shifted dot operands, f32 acc
        scratch = (_tiled_bytes(TH + KH - 1, WpC_pad, in_dtype)
                   + KH * _tiled_bytes(TH, WpC_pad, compute_dtype)
                   + 2 * _tiled_bytes(TH, WoC_pad, jnp.float32))
        return body + halo + wts + bias_b + outb + scratch

    # ---- row-tile auto-sizing: grow while it fits VMEM, keeps >= 4 parallel
    # grid steps (v7x has 2 TensorCores sharded over "parallel" axes), and Ho
    # stays evenly divisible.
    if row_tile is None:
        row_tile = 8
        while (Ho % (row_tile * 2) == 0
               and N * (Ho // (row_tile * 2)) >= 4
               and row_tile * 2 <= 256
               and vmem_need(row_tile * 2) <= (vmem_limit * 3) // 4):
            row_tile *= 2
    TH = row_tile
    assert TH % 8 == 0 and Ho % TH == 0, "row_tile must be a multiple of 8 dividing Ho"
    R = Ho // TH
    assert vmem_need(TH) <= vmem_limit, "row tile too large for VMEM budget"

    # ---- wrapper glue: NCHW -> lane-dense padded slab (see TODOs above).
    Hpad = Ho + KH - 1
    x_nhwc = jnp.transpose(x_nchw, (0, 2, 3, 1))                        # (N,H,W,Cin)
    x_pad = jnp.pad(x_nhwc, ((0, 0), (pad, Hpad - pad - H), (pad, pad), (0, 0)))
    x_pad = x_pad.reshape(N, Hpad, WpC)
    x_pad = jnp.pad(x_pad, ((0, 0), (0, 0), (0, WpC_pad - WpC)))        # lane pad

    # Halo side-array: exactly the KH-1 rows below each row tile (no 8-row
    # over-fetch inside the kernel).
    halo_rows = ((jnp.arange(R) + 1) * TH)[:, None] + jnp.arange(KH - 1)[None, :]
    x_halo = x_pad[:, halo_rows, :]                       # (N, R, KH-1, WpC_pad)

    # ---- block-Toeplitz weights T[kh] of shape (WpC_pad, WoC_pad) with
    #   T[kh][(wo+kw)*Cin + ci, wo*Cout + co] = weight[co, ci, kh, kw]
    # so out[t, wo*Cout+co] = sum_kh x_row[t+kh] @ T[kh]  (natively lane-dense).
    eye_wo = jnp.eye(Wo, dtype=jnp.float32)
    t_list = []
    for kh in range(KH):
        tk = jnp.zeros((WpC_pad, WoC_pad), dtype=jnp.float32)
        for kw in range(KW):
            blk = jnp.kron(eye_wo, weight_oihw[:, :, kh, kw].T)  # (Wo*Cin, Wo*Cout)
            tk = tk.at[kw * Cin:kw * Cin + Wo * Cin, :WoC].add(blk)
        t_list.append(tk)
    w_toep = jnp.stack(t_list).astype(compute_dtype)      # (KH, WpC_pad, WoC_pad)

    # Bias pre-tiled to the output-slab column layout (f32 epilogue).
    b_row = jnp.tile(bias.astype(jnp.float32), Wo)                       # (WoC,)
    b_row = jnp.pad(b_row, (0, WoC_pad - WoC)).reshape(1, WoC_pad)

    kernel = functools.partial(
        _conv_relu_kernel, TH=TH, KH=KH,
        negative_slope=negative_slope, compute_dtype=compute_dtype)

    itemsize_in = jnp.dtype(in_dtype).itemsize
    cost = pl.CostEstimate(
        flops=int(2 * N * Ho * Wo * KH * KW * Cin * Cout),
        transcendentals=0,
        bytes_accessed=int(
            N * Ho * WpC_pad * itemsize_in                      # body blocks
            + N * R * (KH - 1) * WpC_pad * itemsize_in          # halo blocks
            + w_toep.size * jnp.dtype(compute_dtype).itemsize   # Toeplitz weights
            + WoC_pad * 4                                       # bias row
            + N * Ho * WoC_pad * itemsize_in))                  # output slab

    out_flat = pl.pallas_call(
        kernel,
        out_shape=jax.ShapeDtypeStruct((N, Ho, WoC_pad), in_dtype),
        grid_spec=pltpu.PrefetchScalarGridSpec(
            num_scalar_prefetch=0,
            grid=(N, R),
            in_specs=[
                # body rows of this tile: padded rows [r*TH, r*TH + TH)
                pl.BlockSpec((1, TH, WpC_pad), lambda n, r: (n, r, 0)),
                # exactly the KH-1 halo rows for this tile
                pl.BlockSpec((1, 1, KH - 1, WpC_pad), lambda n, r: (n, r, 0, 0)),
                # Toeplitz weights + bias: constant block, stays resident in VMEM
                pl.BlockSpec((KH, WpC_pad, WoC_pad), lambda n, r: (0, 0, 0)),
                pl.BlockSpec((1, WoC_pad), lambda n, r: (0, 0)),
            ],
            out_specs=pl.BlockSpec((1, TH, WoC_pad), lambda n, r: (n, r, 0)),
        ),
        compiler_params=pltpu.CompilerParams(
            dimension_semantics=("parallel", "parallel"),
            vmem_limit_bytes=vmem_limit),
        cost_estimate=cost,
    )(x_pad, x_halo, w_toep, b_row)

    out_nhwc = out_flat[:, :, :WoC].reshape(N, Ho, Wo, Cout)
    return jnp.transpose(out_nhwc, (0, 3, 1, 2))                 # back to NCHW


def _reference(x_nchw, weight_oihw, bias, negative_slope=0.1):
    y = jax.lax.conv_general_dilated(
        x_nchw, weight_oihw, window_strides=(1, 1), padding=((1, 1), (1, 1)),
        dimension_numbers=("NCHW", "OIHW", "NCHW"))
    y = y + bias.reshape(1, -1, 1, 1)
    return jnp.where(y >= 0, y, negative_slope * y)


if __name__ == "__main__":
    key = jax.random.PRNGKey(0)
    k1, k2, k3, k4, k5, k6 = jax.random.split(key, 6)

    # Shape 1: small config implied by the module (batch=2, channels=4->8, 16x16).
    N, Cin, Cout, H, W = 2, 4, 8, 16, 16
    KH = KW = 3
    x = jax.random.normal(k1, (N, Cin, H, W), dtype=jnp.float32)
    weight = jax.random.normal(k2, (Cout, Cin, KH, KW), dtype=jnp.float32) * 0.1
    bias = jax.random.normal(k3, (Cout,), dtype=jnp.float32) * 0.1
    ref = _reference(x, weight, bias)

    out = jax.block_until_ready(conv_relu(x, weight, bias))
    assert out.shape == (N, Cout, H, W)
    assert jnp.allclose(out, ref, rtol=1e-4, atol=1e-5), "f32 mismatch vs ref"

    # bf16 MXU operands (cast right before the dot), f32 accumulate + epilogue.
    out_bf = jax.block_until_ready(
        conv_relu(x, weight, bias, compute_dtype=jnp.bfloat16))
    assert jnp.allclose(out_bf, ref, rtol=5e-2, atol=5e-2), "bf16 mismatch"

    # Shape 2: odd Cin, wider output slab (Wo*Cout = 256), N=1 with R=4 row tiles
    # (exercises the halo path, lane padding, and the >=4 parallel-step rule).
    N2, Cin2, Cout2, H2, W2 = 1, 3, 8, 32, 32
    x2 = jax.random.normal(k4, (N2, Cin2, H2, W2), dtype=jnp.float32)
    w2 = jax.random.normal(k5, (Cout2, Cin2, KH, KW), dtype=jnp.float32) * 0.1
    b2 = jax.random.normal(k6, (Cout2,), dtype=jnp.float32) * 0.1
    ref2 = _reference(x2, w2, b2)
    out2 = jax.block_until_ready(conv_relu(x2, w2, b2))
    assert out2.shape == (N2, Cout2, H2, W2)
    assert jnp.allclose(out2, ref2, rtol=1e-4, atol=1e-5), "shape-2 mismatch"

    print("KERNEL_OK")
</pallas_src>

<mosaic_0001>
module attributes {stable_mosaic.version = 11 : i64} {
  func.func @_conv_relu_kernel(%arg0: i32, %arg1: i32, %arg2: memref<1x8x128xf32, #tpu.memory_space<vmem>>, %arg3: memref<1x1x2x128xf32, #tpu.memory_space<vmem>>, %arg4: memref<3x128x128xf32, #tpu.memory_space<vmem>>, %arg5: memref<1x128xf32, #tpu.memory_space<vmem>>, %arg6: memref<1x8x128xf32, #tpu.memory_space<vmem>>) attributes {dimension_semantics = [#tpu.dimension_semantics<parallel>, #tpu.dimension_semantics<parallel>], iteration_bounds = array<i64: 2, 2>, scalar_prefetch = 0 : i64, scratch_operands = 0 : i64, tpu.core_type = #tpu.core_type<tc>, window_params = [{transform_indices = @transform_0, window_bounds = array<i64: 1, 8, 128>}, {transform_indices = @transform_1, window_bounds = array<i64: 1, 1, 2, 128>}, {pipeline_mode = #tpu.pipeline_mode<synchronous>, transform_indices = @transform_2, window_bounds = array<i64: 3, 128, 128>}, {pipeline_mode = #tpu.pipeline_mode<synchronous>, transform_indices = @transform_3, window_bounds = array<i64: 1, 128>}, {transform_indices = @transform_4, window_bounds = array<i64: 1, 8, 128>}]} {
    %c0 = arith.constant 0 : index
    %c0_0 = arith.constant 0 : index
    %c0_1 = arith.constant 0 : index
    %0 = vector.load %arg2[%c0, %c0_0, %c0_1] : memref<1x8x128xf32, #tpu.memory_space<vmem>>, vector<1x8x128xf32>
    %1 = vector.shape_cast %0 : vector<1x8x128xf32> to vector<8x128xf32>
    %c0_2 = arith.constant 0 : index
    %c0_3 = arith.constant 0 : index
    %c0_4 = arith.constant 0 : index
    %c0_5 = arith.constant 0 : index
    %2 = vector.load %arg3[%c0_2, %c0_3, %c0_4, %c0_5] : memref<1x1x2x128xf32, #tpu.memory_space<vmem>>, vector<1x1x2x128xf32>
    %3 = vector.shape_cast %2 : vector<1x1x2x128xf32> to vector<2x128xf32>
    %c0_6 = arith.constant 0 : index
    %c0_7 = arith.constant 0 : index
    %c0_8 = arith.constant 0 : index
    %4 = vector.load %arg4[%c0_6, %c0_7, %c0_8] : memref<3x128x128xf32, #tpu.memory_space<vmem>>, vector<1x128x128xf32>
    %5 = vector.shape_cast %4 : vector<1x128x128xf32> to vector<128x128xf32>
    %cst = arith.constant dense<0.000000e+00> : vector<8x128xf32>
    %6 = tpu.matmul %1, %5, %cst {dimension_numbers = #tpu.dot_dimension_numbers<[1], [0], [0], [1], [0, 0, 1, 1], [], []>} : vector<8x128xf32>, vector<128x128xf32>, vector<8x128xf32> -> vector<8x128xf32>
    %7 = tpu.concatenate %1, %3 in 0 : vector<8x128xf32>, vector<2x128xf32> -> vector<10x128xf32>
    %8 = vector.extract_strided_slice %7 {offsets = [1, 0], sizes = [8, 128], strides = [1, 1]} : vector<10x128xf32> to vector<8x128xf32>
    %c1 = arith.constant 1 : index
    %c0_9 = arith.constant 0 : index
    %c0_10 = arith.constant 0 : index
    %9 = vector.load %arg4[%c1, %c0_9, %c0_10] : memref<3x128x128xf32, #tpu.memory_space<vmem>>, vector<1x128x128xf32>
    %10 = vector.shape_cast %9 : vector<1x128x128xf32> to vector<128x128xf32>
    %cst_11 = arith.constant dense<0.000000e+00> : vector<8x128xf32>
    %11 = tpu.matmul %8, %10, %cst_11 {dimension_numbers = #tpu.dot_dimension_numbers<[1], [0], [0], [1], [0, 0, 1, 1], [], []>} : vector<8x128xf32>, vector<128x128xf32>, vector<8x128xf32> -> vector<8x128xf32>
    %12 = arith.addf %6, %11 : vector<8x128xf32>
    %13 = vector.extract_strided_slice %7 {offsets = [2, 0], sizes = [8, 128], strides = [1, 1]} : vector<10x128xf32> to vector<8x128xf32>
    %c2 = arith.constant 2 : index
    %c0_12 = arith.constant 0 : index
    %c0_13 = arith.constant 0 : index
    %14 = vector.load %arg4[%c2, %c0_12, %c0_13] : memref<3x128x128xf32, #tpu.memory_space<vmem>>, vector<1x128x128xf32>
    %15 = vector.shape_cast %14 : vector<1x128x128xf32> to vector<128x128xf32>
    %cst_14 = arith.constant dense<0.000000e+00> : vector<8x128xf32>
    %16 = tpu.matmul %13, %15, %cst_14 {dimension_numbers = #tpu.dot_dimension_numbers<[1], [0], [0], [1], [0, 0, 1, 1], [], []>} : vector<8x128xf32>, vector<128x128xf32>, vector<8x128xf32> -> vector<8x128xf32>
    %17 = arith.addf %12, %16 : vector<8x128xf32>
    %c0_15 = arith.constant 0 : index
    %c0_16 = arith.constant 0 : index
    %18 = vector.load %arg5[%c0_15, %c0_16] : memref<1x128xf32, #tpu.memory_space<vmem>>, vector<1x128xf32>
    %19 = vector.broadcast %18 : vector<1x128xf32> to vector<8x128xf32>
    %20 = arith.addf %17, %19 : vector<8x128xf32>
    %cst_17 = arith.constant 0.000000e+00 : f32
    %21 = vector.broadcast %cst_17 : f32 to vector<8x128xf32>
    %22 = arith.cmpf oge, %20, %21 : vector<8x128xf32>
    %cst_18 = arith.constant 1.000000e-01 : f32
    %23 = vector.broadcast %cst_18 : f32 to vector<8x128xf32>
    %24 = arith.mulf %23, %20 : vector<8x128xf32>
    %25 = arith.select %22, %20, %24 : vector<8x128xi1>, vector<8x128xf32>
    %c0_19 = arith.constant 0 : index
    %c0_20 = arith.constant 0 : index
    %c0_21 = arith.constant 0 : index
    %26 = vector.load %arg6[%c0_19, %c0_20, %c0_21] : memref<1x8x128xf32, #tpu.memory_space<vmem>>, vector<1x8x128xf32>
    %27 = vector.shape_cast %26 : vector<1x8x128xf32> to vector<8x128xf32>
    %28 = vector.shape_cast %25 : vector<8x128xf32> to vector<1x8x128xf32>
    tpu.vector_store %arg6[%c0_19, %c0_20, %c0_21], %28 {strides = array<i32>} : memref<1x8x128xf32, #tpu.memory_space<vmem>>, vector<1x8x128xf32>,
    return
  }
  func.func @transform_0(%arg0: i32, %arg1: i32) -> (i32, i32, i32) {
    %c0_i32 = arith.constant 0 : i32
    %c0_i32_0 = arith.constant 0 : i32
    return %arg0, %arg1, %c0_i32 : i32, i32, i32
  }
  func.func @transform_1(%arg0: i32, %arg1: i32) -> (i32, i32, i32, i32) {
    %c0_i32 = arith.constant 0 : i32
    %c0_i32_0 = arith.constant 0 : i32
    %c0_i32_1 = arith.constant 0 : i32
    return %arg0, %arg1, %c0_i32, %c0_i32_0 : i32, i32, i32, i32
  }
  func.func @transform_2(%arg0: i32, %arg1: i32) -> (i32, i32, i32) {
    %c0_i32 = arith.constant 0 : i32
    %c0_i32_0 = arith.constant 0 : i32
    %c0_i32_1 = arith.constant 0 : i32
    %c0_i32_2 = arith.constant 0 : i32
    return %c0_i32, %c0_i32_0, %c0_i32_1 : i32, i32, i32
  }
  func.func @transform_3(%arg0: i32, %arg1: i32) -> (i32, i32) {
    %c0_i32 = arith.constant 0 : i32
    %c0_i32_0 = arith.constant 0 : i32
    %c0_i32_1 = arith.constant 0 : i32
    return %c0_i32, %c0_i32_0 : i32, i32
  }
  func.func @transform_4(%arg0: i32, %arg1: i32) -> (i32, i32, i32) {
    %c0_i32 = arith.constant 0 : i32
    %c0_i32_0 = arith.constant 0 : i32
    return %arg0, %arg1, %c0_i32 : i32, i32, i32
  }
}

</mosaic_0001>

<bundles_post_ra>
// kernel: tpu_custom_call.1
= control target key start
LH: loop header
LB: loop body
LE: loop exit
PB: predicated region body
PF: predicated region fallthrough
CT: control target
= control target key end

     0   :  { %9 = vsyncpa [#allocation3], 0  ;;  %s1333_s0 = inlined_call_operand.vmem [shape: f32[2,18,128], index: 0, kind: input, shape index: {}]   ;;  %s1334_s1 = inlined_call_operand.vmem [shape: f32[2,2,2,128], index: 1, kind: input, shape index: {}]   ;;  %s1335_s2 = inlined_call_operand.hbm [shape: f32[3,128,128], index: 2, kind: input, shape index: {}]   ;;  %s1336_s3 = inlined_call_operand.vmem [shape: f32[1,128], index: 3, kind: input, shape index: {}]   ;;  %s1337_s4 = inlined_call_operand.hbm [shape: f32[2,16,128], index: 4, kind: output, shape index: {}]  }
   0x1   :  { %10 = vsyncpa [#allocation4], 0 }
   0x2   :  { %12 = vsyncpa [#allocation4 + $0x1], 0  ;;  %s1093_s15 = smov 0   ;;  %s1095_s16 = smov 0  }
   0x3   :  { %s1097_s17 = smov 0   ;;  %s1099_s18 = smov 0  }
   0x4   :  { %s1101_s19 = smov 0   ;;  %s1103_s20 = smov 0  }
   0x5   :  { %s1105_s21 = smov 0   ;;  %s1107_s22 = smov 0  }
   0x6 LB: > { %s678_s23 = sadd.s32 4294967295, %s1060_s22   ;;  %s679_s24 = sadd.s32 4294967294, %s1060_s22   ;;  %s1060_s22 = sphi %s1107_s22, %s18_s22   ;;  %s1056_s21 = sphi %s1105_s21, %s1349_s21   ;;  %s1052_s20 = sphi %s1103_s20, %s1348_s20   ;;  %s1048_s19 = sphi %s1101_s19, %s1347_s19   ;;  %s1044_s18 = sphi %s1099_s18, %s1346_s18   ;;  %s1040_s17 = sphi %s1097_s17, %s1345_s17   ;;  %s1036_s16 = sphi %s1095_s16, %s1344_s16   ;;  %s1032_s15 = sphi %s1093_s15, %s1343_s15  }
   0x7   : > { %s27_s25 = sadd.s32 1, %s1052_s20  ;;  %s30_s26 = sadd.s32 1, %s1056_s21 }
   0x8   : > { %p28_p0 = scmp.ge.s32.totalorder %s27_s25, 2  ;;  %s137_s27 = sadd.s32 1, %s1040_s17 }
   0x9   : > { %p147_p1 = scmp.ne.s32.totalorder %s1040_s17, %s1036_s16  ;;  %p148_p2 = scmp.eq.s32.totalorder %s678_s23, 3 }
   0xa   : > { %s1351_s25 = smov (%p28_p0, %s27_s25), 0  ;;  %s1353_s26 = smov (!%p28_p0, %s30_s26), %s1056_s21 }
   0xb   : > { %s133_s28 = ssub.s32 %s1052_s20, %s1351_s25  ;;  %p1145_p3 = por %p148_p2, %p147_p1 }
   0xc   : > { %p32_p4 = scmp.ge.s32.totalorder %s1353_s26, 2  ;;  %p153_p5 = scmp.ne.s32.totalorder %s1036_s16, %s1032_s15 }
   0xd   : > { %p154_p6 = scmp.eq.s32.totalorder %s679_s24, 3  ;;  %p680_p7 = scmp.ge.s32.totalorder %s1060_s22, 1 }
   0xe   : > { %s1355_s26 = smov (%p32_p4, %s1353_s26), 0  ;;  %p161_p9 = scmp.lt.s32.totalorder %s1060_s22, 5 }
   0xf   : > { %p1154_p8 = por %p154_p6, %p153_p5  ;;  %s132_s5 = ssub.s32 %s1056_s21, %s1355_s26 }
  0x10   : > { %s134_s6 = sor.u32 %s133_s28, %s132_s5  ;;  %p1161_p10 = pnand %p680_p7, %p161_p9 }
  0x11   : > { %p135_p11 = scmp.eq.s32.totalorder %s134_s6, 0  ;;  %p1165_p12 = scmp.eq.s32.totalorder %s678_s23, 0 }
  0x12   : > { %p858_p13 = pneg %p1161_p10  ;;  %s1062_s10 = smov [#allocation2]  }
  0x13   : > { %s1172_s9 = scalar_select %p135_p11, %s1040_s17, %s137_s27  }
  0x14   : > { %s173_s11 = sshll.u32 %s1062_s10, 4  ;;  %p1176_p0 = pnand %p1165_p12, %p858_p13  ;;  %s174_s11 = int_to_ptr.vmem [resolvable:$true] %s173_s11 }
  0x15   : > { %s949_s13 = scalar_lea.vmem %s174_s11, 6144  ;;  %p957_p6 = scmp.lt.s32.totalorder %s174_s11, %s174_s11 }
  0x16   : > { %p940_p1 = pneg %p1176_p0  ;;  %p950_p2 = scmp.ne.s32.totalorder %s174_s11, %s949_s13 }
  0x17   : > { %p958_p7 = scmp.lt.s32.totalorder %s949_s13, %s949_s13 }
  0x18   : > { %p952_p4 = pnand %p950_p2, %p940_p1 }
  0x19   : > { %p959_p9 = por %p958_p7, %p957_p6 }
  0x1a   : > { %p953_p5 = pneg %p952_p4 }
  0x1c   : > { %p960_p11 = pnand %p959_p9, %p953_p5 }
  0x1e   : > { %963 = shalt.err (!%p960_p11)
}
  0x1f   : > { %s1063_s14 = smov 128   ;;  %s1064_s23 = smov 8  }
  0x20   : > { %861 = dma.hbm_to_vmem [thread:$0]  (!%p1176_p0), %s1335_s2, 6144, %s174_s11, [#allocation3], %s1063_s14, %s1063_s14, %s1064_s23  }
  0x21   : > { %214 = sbr.rel (%p1161_p10) target bundleno = 318 (0x13e), region = 36 }
  0x26   : > { %1023 = dma.done.wait (%p1165_p12), [#allocation3], 6144  }
  0x27   : > { %1025 = vsyncadd (%p1165_p12), [#allocation3], 4294961152  ;;  %v1065_v0 = vmov 0.0   ;;  %vm1066_vm0 = vmmov 0   ;;  %v301_v1 = vld [vmem:[#allocation2 + $0xf8] sm:$0xff]  ;;  %v300_v3 = vld [vmem:[#allocation2 + $0xf0] sm:$0xff] }
  0x28   : > { %746 = vmatprep.subr.mxu0 %v1065_v0  ;;  %781 = vmatprep.subr.mxu1 %v1065_v0  ;;  %v284_v2 = vld [vmem:[#allocation2 + $0x78] sm:$0xff]  ;;  %p251_p10 = scmp.lt.s32.totalorder %s1048_s19, 1  ;;  %v283_v4 = vld [vmem:[#allocation2 + $0x70] sm:$0xff]  ;;  %v299_v5 = vld [vmem:[#allocation2 + $0xe8] sm:$0xff]  ;;  %p253_p12 = scmp.lt.s32.totalorder %s1044_s18, 2  ;;  %vm304_vm1 = vcmask 1046528  }
  0x29   : > { %778 = vmatprep.mubr.msk.f32.mxu0 %vm1066_vm0, %v1065_v0  ;;  %813 = vmatprep.mubr.msk.f32.mxu1 %vm1066_vm0, %v1065_v0  ;;  %v282_v6 = vld [vmem:[#allocation2 + $0x68] sm:$0xff]  ;;  %v298_v7 = vld [vmem:[#allocation2 + $0xe0] sm:$0xff]  ;;  %p261_p13 = scmp.lt.s32.totalorder %s1044_s18, 1  ;;  %v297_v9 = vld [vmem:[#allocation2 + $0xd8] sm:$0xff]  ;;  %vm466_vm2 = vcmask 1045504  }
  0x2a   : > { %747 = vmatpush3.msra.mxu0 %v301_v1  ;;  %782 = vmatpush3.msra.mxu1 %v284_v2  ;;  %v281_v8 = vld [vmem:[#allocation2 + $0x60] sm:$0xff]  ;;  %s1208_s28 = scalar_select %p251_p10, %s1048_s19, 1  ;;  %v280_v10 = vld [vmem:[#allocation2 + $0x58] sm:$0xff]  ;;  %v296_v11 = vld [vmem:[#allocation2 + $0xd0] sm:$0xff] }
  0x2b   : > { %748 = vmatprep.subr.mxu0 %v1065_v0  ;;  %783 = vmatprep.subr.mxu1 %v1065_v0  ;;  %s254_s5 = scalar_select %p253_p12, %s1044_s18, 2  ;;  %v279_v12 = vld [vmem:[#allocation2 + $0x50] sm:$0xff]  ;;  %v295_v13 = vld [vmem:[#allocation2 + $0xc8] sm:$0xff]  ;;  %v294_v15 = vld [vmem:[#allocation2 + $0xc0] sm:$0xff] }
  0x2c   : > { %749 = vmatpush3.msra.mxu0 %v300_v3  ;;  %784 = vmatpush3.msra.mxu1 %v283_v4  ;;  %s851_s6 = smul.u32 3, %s1208_s28  ;;  %v278_v14 = vld [vmem:[#allocation2 + $0x48] sm:$0xff]  ;;  %s687_s8 = sshll.u32 %s1208_s28, 1  ;;  %v277_v16 = vld [vmem:[#allocation2 + $0x40] sm:$0xff]  ;;  %v293_v17 = vld [vmem:[#allocation2 + $0xb8] sm:$0xff] }
  0x2d   : > { %750 = vmatprep.subr.mxu0 %v1065_v0  ;;  %785 = vmatprep.subr.mxu1 %v1065_v0  ;;  %s262_s7 = scalar_select %p261_p13, %s1044_s18, 1  ;;  %v276_v18 = vld [vmem:[#allocation2 + $0x38] sm:$0xff]  ;;  %v292_v19 = vld [vmem:[#allocation2 + $0xb0] sm:$0xff]  ;;  %v291_v21 = vld [vmem:[#allocation2 + $0xa8] sm:$0xff] }
  0x2e   : > { %751 = vmatpush3.msra.mxu0 %v299_v5  ;;  %786 = vmatpush3.msra.mxu1 %v282_v6  ;;  %s256_s10 = sadd.s32 %s851_s6, %s254_s5  ;;  %v275_v20 = vld [vmem:[#allocation2 + $0x30] sm:$0xff]  ;;  %v274_v22 = vld [vmem:[#allocation2 + $0x28] sm:$0xff]  ;;  %v290_v23 = vld [vmem:[#allocation2 + $0xa0] sm:$0xff]  ;;  %s248_s6 = sand.u32 1, %s1036_s16  }
  0x2f   : > { %752 = vmatprep.subr.mxu0 %v1065_v0  ;;  %787 = vmatprep.subr.mxu1 %v1065_v0  ;;  %s264_s11 = sadd.s32 %s687_s8, %s262_s7  ;;  %s686_s12 = sshll.u32 %s256_s10, 3  ;;  %v273_v24 = vld [vmem:[#allocation2 + $0x20] sm:$0xff]  ;;  %v289_v25 = vld [vmem:[#allocation2 + $0x98] sm:$0xff]  ;;  %v288_v29 = vld [vmem:[#allocation2 + $0x90] sm:$0xff] }
  0x30   : > { %753 = vmatpush3.msra.mxu0 %v298_v7  ;;  %788 = vmatpush3.msra.mxu1 %v281_v8  ;;  %s688_s13 = sshll.u32 %s264_s11, 1  ;;  %s258_s24 = scalar_lea.vmem %s1333_s0, %s686_s12  ;;  %v272_v26 = vld [vmem:[#allocation2 + $0x18] sm:$0xff]  ;;  %v271_v30 = vld [vmem:[#allocation2 + $0x10] sm:$0xff]  ;;  %v287_v33 = vld [vmem:[#allocation2 + $0x88] sm:$0xff] }
  0x31   : > { %754 = vmatprep.subr.mxu0 %v1065_v0  ;;  %789 = vmatprep.subr.mxu1 %v1065_v0  ;;  %s266_s5 = scalar_lea.vmem %s1334_s1, %s688_s13  ;;  %v1243_v27 = vld [vmem:[%s258_s24] sm:$0xff]  ;;  %v270_v34 = vld [vmem:[#allocation2 + $0x8] sm:$0xff]  ;;  %v465_v38 = vld [vmem:[#allocation2 + $0x178] sm:$0xff]  ;;  %s685_s7 = sshll.u32 %s248_s6, 3 }
  0x32   : > { %755 = vmatpush3.msra.mxu0 %v297_v9  ;;  %790 = vmatpush3.msra.mxu1 %v280_v10  ;;  %v1245_v28 = vld [vmem:[%s266_s5] sm:$0x3]  ;;  %v305_v31 = vrot.slane %v1243_v27, 1  ;;  %v464_v39 = vld [vmem:[#allocation2 + $0x170] sm:$0xff]  ;;  %v463_v40 = vld [vmem:[#allocation2 + $0x168] sm:$0xff]  ;;  %v467_v52 = vrot.slane %v1243_v27, 2 }
  0x33   : > { %756 = vmatprep.subr.mxu0 %v1065_v0  ;;  %791 = vmatprep.subr.mxu1 %v1065_v0  ;;  %v306_v32 = vrot.slane %v1245_v28, 1  ;;  %v286_v35 = vld [vmem:[#allocation2 + $0x80] sm:$0xff]  ;;  %v461_v42 = vld [vmem:[#allocation2 + $0x158] sm:$0xff]  ;;  %v460_v43 = vld [vmem:[#allocation2 + $0x150] sm:$0xff]  ;;  %v468_v53 = vrot.slane %v1245_v28, 2  ;;  %s691_s8 = sshll.u32 %s1048_s19, 1 }
  0x34   : > { %757 = vmatpush3.msra.mxu0 %v296_v11  ;;  %792 = vmatpush3.msra.mxu1 %v279_v12  ;;  %v269_v36 = vld [vmem:[#allocation2] sm:$0xff]  ;;  %v459_v44 = vld [vmem:[#allocation2 + $0x148] sm:$0xff]  ;;  %v457_v46 = vld [vmem:[#allocation2 + $0x138] sm:$0xff]  ;;  %s566_s12 = sadd.s32 %s1044_s18, %s691_s8  ;;  %s250_s14 = scalar_lea.vmem [#allocation5], %s685_s7 }
  0x35   : > { %758 = vmatprep.subr.mxu0 %v1065_v0  ;;  %793 = vmatprep.subr.mxu1 %v1065_v0  ;;  %v307_v37 = vsel %vm304_vm1, %v305_v31, %v306_v32  ;;  %v462_v41 = vld [vmem:[#allocation2 + $0x160] sm:$0xff]  ;;  %v456_v47 = vld [vmem:[#allocation2 + $0x130] sm:$0xff]  ;;  %v455_v48 = vld [vmem:[#allocation2 + $0x128] sm:$0xff]  ;;  %v469_v56 = vsel %vm466_vm2, %v467_v52, %v468_v53  ;;  %s692_s13 = sshll.u32 %s566_s12, 7  ;;  %s570_s23 = sshll.u32 %s250_s14, 4  ;;  %s571_s23 = int_to_ptr.vmem [resolvable:$true] %s570_s23 }
  0x36   : > { %759 = vmatpush3.msra.mxu0 %v295_v13  ;;  %794 = vmatpush3.msra.mxu1 %v278_v14  ;;  %v458_v45 = vld [vmem:[#allocation2 + $0x140] sm:$0xff]  ;;  %v453_v50 = vld [vmem:[#allocation2 + $0x118] sm:$0xff]  ;;  %v452_v51 = vld [vmem:[#allocation2 + $0x110] sm:$0xff]  ;;  %s1287_s19 = scalar_lea.hbm %s1337_s4, %s692_s13  ;;  %s555_s28 = scalar_lea.sflag [#allocation4], %s248_s6 }
  0x37   : > { %760 = vmatprep.subr.mxu0 %v1065_v0  ;;  %795 = vmatprep.subr.mxu1 %v1065_v0  ;;  %v454_v49 = vld [vmem:[#allocation2 + $0x120] sm:$0xff]  ;;  %v451_v54 = vld [vmem:[#allocation2 + $0x108] sm:$0xff]  ;;  %s964_s5 = scalar_lea.vmem %s571_s23, 128  ;;  %s1067_s18 = smov [#allocation5]  }
  0x38   : > { %761 = vmatpush3.msra.mxu0 %v294_v15  ;;  %796 = vmatpush3.msra.mxu1 %v277_v16  ;;  %v450_v55 = vld [vmem:[#allocation2 + $0x100] sm:$0xff]  ;;  %p965_p0 = scmp.ne.s32.totalorder %s571_s23, %s964_s5  ;;  %s968_s8 = sshll.u32 %s1067_s18, 4  ;;  %s969_s8 = int_to_ptr.vmem [resolvable:$false] %s968_s8 }
  0x39   : > { %762 = vmatprep.subr.mxu0 %v1065_v0  ;;  %797 = vmatprep.subr.mxu1 %v1065_v0  ;;  %v689_v63 = vld [vmem:[%s1336_s3] ss:$0 sm:$0xff]  ;;  %s970_s7 = scalar_lea.vmem %s969_s8, 256  ;;  %p971_p4 = scmp.lt.s32.totalorder %s571_s23, %s969_s8 }
  0x3a   : > { %763 = vmatpush3.msra.mxu0 %v293_v17  ;;  %798 = vmatpush3.msra.mxu1 %v276_v18  ;;  %p966_p1 = pnand %p965_p0, %p1145_p3  ;;  %p972_p5 = scmp.lt.s32.totalorder %s970_s7, %s964_s5 }
  0x3b   : > { %764 = vmatprep.subr.mxu0 %v1065_v0  ;;  %799 = vmatprep.subr.mxu1 %v1065_v0 }
  0x3c   : > { %765 = vmatpush3.msra.mxu0 %v292_v19  ;;  %800 = vmatpush3.msra.mxu1 %v275_v20  ;;  %p967_p2 = pneg %p966_p1  ;;  %p973_p6 = por %p972_p5, %p971_p4 }
  0x3d   : > { %766 = vmatprep.subr.mxu0 %v1065_v0  ;;  %801 = vmatprep.subr.mxu1 %v1065_v0 }
  0x3e   : > { %767 = vmatpush3.msra.mxu0 %v291_v21  ;;  %802 = vmatpush3.msra.mxu1 %v274_v22  ;;  %p974_p7 = pnand %p973_p6, %p967_p2 }
  0x3f   : > { %768 = vmatprep.subr.mxu0 %v1065_v0  ;;  %803 = vmatprep.subr.mxu1 %v1065_v0 }
  0x40   : > { %769 = vmatpush3.msra.mxu0 %v290_v23  ;;  %804 = vmatpush3.msra.mxu1 %v273_v24 }
  0x41   : > { %770 = vmatprep.subr.mxu0 %v1065_v0  ;;  %805 = vmatprep.subr.mxu1 %v1065_v0 }
  0x42   : > { %771 = vmatpush3.msra.mxu0 %v289_v25  ;;  %806 = vmatpush3.msra.mxu1 %v272_v26 }
  0x43   : > { %772 = vmatprep.subr.mxu0 %v1065_v0  ;;  %807 = vmatprep.subr.mxu1 %v1065_v0 }
  0x44   : > { %773 = vmatpush3.msra.mxu0 %v288_v29  ;;  %808 = vmatpush3.msra.mxu1 %v271_v30 }
  0x45   : > { %774 = vmatprep.subr.mxu0 %v1065_v0  ;;  %809 = vmatprep.subr.mxu1 %v1065_v0 }
  0x46   : > { %775 = vmatpush3.msra.mxu0 %v287_v33  ;;  %810 = vmatpush3.msra.mxu1 %v270_v34 }
  0x47   : > { %776 = vmatprep.subr.mxu0 %v1065_v0  ;;  %811 = vmatprep.subr.mxu1 %v1065_v0 }
  0x48   : > { %777 = vmatpush3.msra.mxu0 %v286_v35  ;;  %812 = vmatpush3.msra.mxu1 %v269_v36 }
  0x49   : > { %779 = vmatmul.mubr.f32.vlgmr.msra.gmra.mxu0 %v307_v37  ;;  %816 = vmatprep.subr.mxu0 %v1065_v0 }
  0x4a   : > { %814 = vmatmul.mubr.f32.vlgmr.msra.gmra.mxu1 %v1243_v27  ;;  %817 = vmatpush3.msra.mxu0 %v465_v38 }
  0x4b   : > { %818 = vmatprep.subr.mxu0 %v1065_v0  ;;  %848 = vmatprep.mubr.msk.f32.mxu0 %vm1066_vm0, %v1065_v0 }
  0x4c   : > { %819 = vmatpush3.msra.mxu0 %v464_v39 }
  0x4d   : > { %820 = vmatprep.subr.mxu0 %v1065_v0 }
  0x4e   : > { %821 = vmatpush3.msra.mxu0 %v463_v40 }
  0x4f   : > { %822 = vmatprep.subr.mxu0 %v1065_v0 }
  0x50   : > { %823 = vmatpush3.msra.mxu0 %v462_v41 }
  0x51   : > { %824 = vmatprep.subr.mxu0 %v1065_v0 }
  0x52   : > { %825 = vmatpush3.msra.mxu0 %v461_v42 }
  0x53   : > { %826 = vmatprep.subr.mxu0 %v1065_v0 }
  0x54   : > { %827 = vmatpush3.msra.mxu0 %v460_v43 }
  0x55   : > { %828 = vmatprep.subr.mxu0 %v1065_v0 }
  0x56   : > { %829 = vmatpush3.msra.mxu0 %v459_v44 }
  0x57   : > { %830 = vmatprep.subr.mxu0 %v1065_v0 }
  0x58   : > { %831 = vmatpush3.msra.mxu0 %v458_v45 }
  0x59   : > { %832 = vmatprep.subr.mxu0 %v1065_v0 }
  0x5a   : > { %833 = vmatpush3.msra.mxu0 %v457_v46 }
  0x5b   : > { %834 = vmatprep.subr.mxu0 %v1065_v0 }
  0x5c   : > { %835 = vmatpush3.msra.mxu0 %v456_v47 }
  0x5d   : > { %836 = vmatprep.subr.mxu0 %v1065_v0 }
  0x5e   : > { %837 = vmatpush3.msra.mxu0 %v455_v48 }
  0x5f   : > { %838 = vmatprep.subr.mxu0 %v1065_v0 }
  0x60   : > { %839 = vmatpush3.msra.mxu0 %v454_v49 }
  0x61   : > { %840 = vmatprep.subr.mxu0 %v1065_v0 }
  0x62   : > { %841 = vmatpush3.msra.mxu0 %v453_v50 }
  0x63   : > { %842 = vmatprep.subr.mxu0 %v1065_v0 }
  0x64   : > { %843 = vmatpush3.msra.mxu0 %v452_v51 }
  0x65   : > { %844 = vmatprep.subr.mxu0 %v1065_v0 }
  0x66   : > { %845 = vmatpush3.msra.mxu0 %v451_v54 }
  0x67   : > { %846 = vmatprep.subr.mxu0 %v1065_v0 }
  0x68   : > { %847 = vmatpush3.msra.mxu0 %v450_v55 }
  0x69   : > { %849 = vmatmul.mubr.f32.vlgmr.msra.gmra.mxu0 %v469_v56 }
 0x109   : > { %v375_v57 = vpop.f32.mrf.mxu0 }
 0x10a   : > { %v445_v58 = vpop.f32.mrf.mxu1 }
 0x10b   : > { %v780_v59 = vpop.f32.mrf.mxu0  ;;  %v446_v61 = vadd.f32 %v445_v58, %v375_v57 }
 0x10c   : > { %v815_v60 = vpop.f32.mrf.mxu1 }
 0x129   : > { %v537_v62 = vpop.f32.mrf.mxu0 }
 0x12a   : > { %v541_v1 = vadd.f32 %v537_v62, %v446_v61 }
 0x12b   : > { %v850_v2 = vpop.f32.mrf.mxu0 }
 0x12c   : > { %v549_v0 = vadd.f32 %v689_v63, %v541_v1 }
 0x12e   : > { %vm550_vm3 = vcmp.ge.f32.partialorder %v549_v0, 0.0  ;;  %v551_v3 = vmul.f32 0.1, %v549_v0 }
 0x130   : > { %v552_v4 = vsel %vm550_vm3, %v549_v0, %v551_v3 }
 0x131   : > { %553 = vst [vmem:[%s250_s14] sm:$0xff] %v552_v4 }
 0x132   : > { %977 = shalt.err (!%p974_p7)
}
 0x133   : > { %s978_s10 = scalar_lea.hbm %s1287_s19, 128  ;;  %s982_s12 = scalar_lea.hbm %s1337_s4, 512 }
 0x134   : > { %p979_p9 = scmp.ne.s32.totalorder %s1287_s19, %s978_s10  ;;  %p983_p12 = scmp.lt.s32.totalorder %s1287_s19, %s1337_s4 }
 0x135   : > { %p984_p13 = scmp.lt.s32.totalorder %s982_s12, %s978_s10 }
 0x136   : > { %p980_p11 = pnand %p979_p9, %p1145_p3 }
 0x137   : > { %p985_p0 = por %p984_p13, %p983_p12 }
 0x138   : > { %p981_p10 = pneg %p980_p11 }
 0x13a   : > { %p986_p1 = pnand %p985_p0, %p981_p10 }
 0x13c   : > { %989 = shalt.err (!%p986_p1)
}
 0x13d   : > { %856 = dma.vmem_to_hbm [thread:$0]  (%p1145_p3), %s571_s23, 128, %s1287_s19, %s555_s28  }
 0x13e PF: > { %p868_p2 = scmp.ge.s32.totalorder %s1060_s22, 2  ;;  %s582_s24 = sand.u32 1, %s1032_s15  }
 0x13f   : > { %s583_s27 = scalar_lea.sflag [#allocation4], %s582_s24 }
 0x140   : > { %p863_p4 = pnand %p868_p2, %p1154_p8 }
 0x142   : > { %p864_p5 = pneg %p863_p4 }
 0x144   : > { %1027 = dma.done.wait (%p864_p5), %s583_s27, 128  }
 0x145   : > { %1029 = vsyncadd (%p864_p5), %s583_s27, 4294967168  ;;  %s18_s22 = sadd.s32 1, %s1060_s22   ;;  %s1343_s15 = smov %s1036_s16 }
 0x146   : > { %p15_p6 = scmp.ge.s32.totalorder %s18_s22, 6   ;;  %s1344_s16 = smov %s1040_s17 }
 0x147   : > { %s1345_s17 = smov %s1172_s9  ;;  %s1346_s18 = smov %s1052_s20 }
 0x148   : > { %s1347_s19 = smov %s1056_s21  ;;  %s1348_s20 = smov %s1351_s25 }
 0x149   : > { %s1349_s21 = smov %s1355_s26  ;;  %17 = sbr.rel (!%p15_p6) target bundleno = 6 (0x6), region = 81 }
 0x14e   :  { %588 = vsyncpa [#allocation3], 1 }
 0x14f   :  { %590 = vsyncpa [#allocation3 + $0x1], 1 }
 0x150   :  { %591 = vsyncpa [#allocation4], 1 }
 0x151   :  { %593 = vsyncpa [#allocation4 + $0x1], 1 }

</bundles_post_ra>
